<compile_context>
chip_gen: v6e
topology: v6e:2x2x1
jax: 0.10.0
libtpu: 0.0.40
codegen_flags: <defaults>
</compile_context>

<pallas_src>
import math

import jax
import jax.numpy as jnp
from jax.experimental import pallas as pl
from jax.experimental.pallas import tpu as pltpu


def _round_up(x, m):
    return (x + m - 1) // m * m


def _vmem_capacity_bytes():
    try:
        cap = getattr(pltpu.get_tpu_info(), "vmem_capacity_bytes", None)
        if cap:
            return int(cap)
    except Exception:
        pass
    return 64 << 20          # conservative fallback (v7x per-core VMEM)


# ---------------------------------------------------------------------------
# Kernels.  Grid = (batch-tile b, row-tile i of A, contraction-tile k over N).
# Reduction axis k is last ("arbitrary").  Output block and the f32 accumulator
# stay VMEM-resident across k; init at k==0, finalize at k==last.
# ---------------------------------------------------------------------------
def _make_kernel(ax_first, x_resident, tk):
    def _x_tile(x_ref):
        if x_resident:
            start = pl.multiple_of(pl.program_id(2) * tk, tk)
            return x_ref[:, pl.ds(start, tk), :]
        return x_ref[...]

    if ax_first:
        # out = (A @ X_aug) @ Wt_aug ; the bias rides X_aug's ones column.
        def kernel(a_ref, x_ref, wt_ref, o_ref, acc_ref):
            k = pl.program_id(2)

            @pl.when(k == 0)
            def _init():
                acc_ref[...] = jnp.zeros_like(acc_ref)

            acc_ref[...] += jnp.einsum(
                'bij,bjk->bik', a_ref[...], _x_tile(x_ref),
                preferred_element_type=jnp.float32)

            @pl.when(k == pl.num_programs(2) - 1)
            def _finalize():
                bt_, tm_, ip = acc_ref.shape
                ax = acc_ref[...].reshape(bt_ * tm_, ip).astype(wt_ref.dtype)
                out = jnp.dot(ax, wt_ref[...],
                              preferred_element_type=jnp.float32)
                o_ref[...] = out.reshape(bt_, tm_, -1).astype(o_ref.dtype)
    else:
        # out = A @ (X_aug @ Wt_aug)
        def kernel(a_ref, x_ref, wt_ref, o_ref, acc_ref):
            k = pl.program_id(2)

            @pl.when(k == 0)
            def _init():
                acc_ref[...] = jnp.zeros_like(acc_ref)

            x = _x_tile(x_ref)
            bt_, tk_, ip = x.shape
            support = jnp.dot(x.reshape(bt_ * tk_, ip), wt_ref[...],
                              preferred_element_type=jnp.float32)
            support = support.reshape(bt_, tk_, -1).astype(a_ref.dtype)
            acc_ref[...] += jnp.einsum(
                'bij,bjk->bik', a_ref[...], support,
                preferred_element_type=jnp.float32)

            @pl.when(k == pl.num_programs(2) - 1)
            def _finalize():
                o_ref[...] = acc_ref[...].astype(o_ref.dtype)

    return kernel


# ---------------------------------------------------------------------------
# Wrapper
# ---------------------------------------------------------------------------
def graph_conv(channel_conn, img_feature, weight, bias=None, *,
               compute_dtype=jnp.bfloat16, bt=None, tm=None, tk=None):
    """out = channel_conn @ (img_feature @ weight.T + bias)

    channel_conn: (B, N, N); img_feature: (B, N, inp);
    weight: (outp, inp)  [nn.Linear layout]; bias: (outp,) or None.

    compute_dtype: dtype fed to the MXU (default bf16: ~3x MXU throughput and
      ~2x less HBM traffic vs f32; accumulation is always f32).  Pass None to
      use the promoted input/weight dtype (no silent down-cast of f32 weights).
    Returns (B, N, outp) in img_feature.dtype.
    """
    B, N, _ = channel_conn.shape
    inp = img_feature.shape[-1]
    outp = weight.shape[0]
    out_dtype = img_feature.dtype
    if compute_dtype is None:
        compute_dtype = jnp.promote_types(img_feature.dtype, weight.dtype)
    cdt = jnp.dtype(compute_dtype)
    csize = cdt.itemsize
    osize = jnp.dtype(out_dtype).itemsize
    if bias is None:
        bias = jnp.zeros((outp,), dtype=weight.dtype)

    bt_arg, tm_arg, tk_arg = bt, tm, tk

    # ---- static padded widths ------------------------------------------------
    outp_pad = _round_up(outp, 128)             # lane-dense output stores
    inp_aug = inp + 1                           # ones column carries the bias
    inp_pad = _round_up(inp_aug, 128)           # lane-dense X loads / MXU K dim
    ax_first = inp_pad <= outp_pad              # compare MXU-effective widths

    # ---- tiling defaults -------------------------------------------------------
    if tm is None or tk is None:
        if N <= 512:
            t = _round_up(max(N, 1), 128)       # full-lane A loads / MXU passes
            tm = t if tm is None else tm
            tk = t if tk is None else tk
        else:
            tm = 256 if tm is None else tm      # lcm 256 keeps n_pad tight
            tk = 256 if tk is None else tk
    n_pad = _round_up(N, math.lcm(tm, tk))
    assert tm % 8 == 0 and (tk % 128 == 0 or tk == n_pad)

    if bt is None:
        bt = min(B, 8)

    # ---- per-generation VMEM budget & working-set sizing -----------------------
    vmem_cap = _vmem_capacity_bytes()
    budget = int(vmem_cap * 0.70)               # ~90 MiB v5e/v6e, ~45 MiB v7x

    x_res = (n_pad // tm) > 1    # resident X only pays off with >1 row tile

    def _working_set(bt_, tm_, tk_, xres):
        a_blk = 2 * bt_ * tm_ * tk_ * csize                       # double-buffered
        x_blk = (2 * bt_ * n_pad * inp_pad * csize if xres
                 else 2 * bt_ * tk_ * inp_pad * csize)
        w_blk = inp_pad * outp_pad * csize                        # single-buffered
        o_blk = 2 * bt_ * tm_ * outp_pad * osize
        acc = bt_ * tm_ * (inp_pad if ax_first else outp_pad) * 4
        return a_blk + x_blk + w_blk + o_blk + acc

    while _working_set(bt, tm, tk, x_res) > budget:
        if bt > 1 and bt_arg is None:
            bt //= 2
            continue
        if x_res:
            x_res = False
            continue
        if tk_arg is None and tk > 128:
            cand = tk // 2
            if cand % 128 != 0:
                cand = 128
            if n_pad % cand == 0:
                tk = cand
                continue
        if tm_arg is None and tm > 8:
            cand = max(8, tm // 2)
            if cand % 8 == 0 and n_pad % cand == 0:
                tm = cand
                continue
        # TODO(synk): tile outp_pad / inp_pad (stream the weight) for layers
        # whose resident W^T alone exceeds the per-generation VMEM budget.
        break

    # ---- v7x: keep both TensorCores busy (>= 2 parallel grid steps) ------------
    def _b_steps(bt_):
        return _round_up(B, bt_) // bt_

    if _b_steps(bt) * (n_pad // tm) < 2:
        if bt_arg is None and bt > 1:
            while bt > 1 and _b_steps(bt) < 2:
                bt //= 2
        elif (tm_arg is None and tm >= 16 and (tm // 2) % 8 == 0
              and n_pad % (tm // 2) == 0):
            tm //= 2

    b_pad = _round_up(B, bt)
    grid = (b_pad // bt, n_pad // tm, n_pad // tk)

    # ---- one-time wrapper-side layout work --------------------------------------
    # X_aug @ Wt_aug == X @ W^T + b (ones column x bias row).  Zero padding keeps
    # the math exact: padded A rows/cols and padded X rows are zero (so they add
    # nothing, including no spurious bias), padded outputs are sliced away.
    a_p = jnp.pad(channel_conn.astype(cdt),
                  ((0, b_pad - B), (0, n_pad - N), (0, n_pad - N)))
    x_aug = jnp.concatenate(
        [img_feature.astype(cdt), jnp.ones((B, N, 1), dtype=cdt)], axis=-1)
    x_p = jnp.pad(x_aug,
                  ((0, b_pad - B), (0, n_pad - N), (0, inp_pad - inp_aug)))
    wt_aug = jnp.concatenate(
        [jnp.transpose(weight).astype(cdt),
         bias.reshape(1, outp).astype(cdt)], axis=0)              # (inp+1, outp)
    wt_p = jnp.pad(wt_aug, ((0, inp_pad - inp_aug), (0, outp_pad - outp)))

    kernel = _make_kernel(ax_first, x_res, tk)
    scratch = [pltpu.VMEM((bt, tm, inp_pad if ax_first else outp_pad),
                          jnp.float32)]

    if ax_first:
        flops = 2 * b_pad * n_pad * (n_pad * inp_pad + inp_pad * outp_pad)
    else:
        flops = 2 * b_pad * n_pad * (inp_pad * outp_pad * (n_pad // tm)
                                     + n_pad * outp_pad)
    bytes_accessed = int((a_p.size + x_p.size + wt_p.size) * csize
                         + b_pad * n_pad * outp_pad * osize)
    vmem_limit = int(min(vmem_cap,
                         max(32 << 20,
                             _working_set(bt, tm, tk, x_res) + (8 << 20))))

    def _call(single_buffer_weight):
        if x_res:
            x_spec = pl.BlockSpec((bt, n_pad, inp_pad), lambda b, i, k: (b, 0, 0))
        else:
            x_spec = pl.BlockSpec((bt, tk, inp_pad), lambda b, i, k: (b, k, 0))
        wt_kwargs = {}
        if single_buffer_weight and hasattr(pl, "Buffered"):
            wt_kwargs["pipeline_mode"] = pl.Buffered(1)   # grid-constant operand
        in_specs = [
            pl.BlockSpec((bt, tm, tk), lambda b, i, k: (b, i, k)),    # A tile
            x_spec,                                                   # X (augmented)
            pl.BlockSpec((inp_pad, outp_pad), lambda b, i, k: (0, 0),
                         **wt_kwargs),                                # W^T resident
        ]
        out_spec = pl.BlockSpec((bt, tm, outp_pad), lambda b, i, k: (b, i, 0))
        return pl.pallas_call(
            kernel,
            out_shape=jax.ShapeDtypeStruct((b_pad, n_pad, outp_pad), out_dtype),
            grid_spec=pltpu.PrefetchScalarGridSpec(
                num_scalar_prefetch=0,
                grid=grid,
                in_specs=in_specs,
                out_specs=out_spec,
                scratch_shapes=scratch),
            compiler_params=pltpu.CompilerParams(
                dimension_semantics=("parallel", "parallel", "arbitrary"),
                vmem_limit_bytes=vmem_limit),
            cost_estimate=pl.CostEstimate(flops=int(flops), transcendentals=0,
                                          bytes_accessed=bytes_accessed),
        )(a_p, x_p, wt_p)

    try:
        out_p = _call(True)
    except Exception:
        # Fallback for jax builds that reject pipeline_mode on pallas_call specs.
        out_p = _call(False)

    return out_p[:B, :N, :outp]


# ---------------------------------------------------------------------------
# Self-test
# ---------------------------------------------------------------------------
if __name__ == "__main__":
    def _ref(a, x, w, b):
        return a @ (x @ w.T + b)

    def _run_case(key, B, N, INP, OUTP, tol, **kw):
        k_a, k_x, k_w, k_b = jax.random.split(key, 4)
        a = jax.random.normal(k_a, (B, N, N), dtype=jnp.float32)
        x = jax.random.normal(k_x, (B, N, INP), dtype=jnp.float32)
        bound = 1.0 / (INP ** 0.5)
        w = jax.random.uniform(k_w, (OUTP, INP), jnp.float32, -bound, bound)
        b = jax.random.uniform(k_b, (OUTP,), jnp.float32, -bound, bound)

        out = jax.block_until_ready(graph_conv(a, x, w, b, **kw))
        ref = _ref(a, x, w, b)
        assert out.shape == (B, N, OUTP)
        # Relative max-error check (robust to TPU matmul precision / association
        # order; still catches real indexing / bias / padding bugs decisively).
        err = float(jnp.max(jnp.abs(out - ref)) / (jnp.max(jnp.abs(ref)) + 1e-6))
        assert err < tol, f"relative error too large: {err} (tol {tol})"

    key = jax.random.PRNGKey(0)
    keys = jax.random.split(key, 5)

    BF16_TOL = 3e-2   # bf16 MXU operands (default), f32 accumulation
    F32_TOL = 1e-2    # f32 compute path (TPU default matmul precision)

    # 1) small, module-consistent shapes -> (A@X)@Wt path, single tile
    _run_case(keys[0], B=2, N=8, INP=32, OUTP=16, tol=BF16_TOL)
    # 2) inp_pad > outp_pad -> A@(X@Wt) path
    _run_case(keys[1], B=2, N=8, INP=160, OUTP=16, tol=BF16_TOL)
    # 3) non-aligned B/N, explicit tiling, resident X, (A@X)@Wt path
    _run_case(keys[2], B=3, N=200, INP=48, OUTP=80, tol=BF16_TOL,
              bt=2, tm=64, tk=128)
    # 4) tiled support-first path with resident X
    _run_case(keys[3], B=2, N=200, INP=192, OUTP=8, tol=BF16_TOL,
              tm=64, tk=128)
    # 5) f32 compute path (no bf16 down-cast of f32 weights)
    _run_case(keys[4], B=2, N=64, INP=48, OUTP=80, tol=F32_TOL,
              compute_dtype=jnp.float32)

    print("KERNEL_OK")
</pallas_src>

<mosaic_0001>
module attributes {stable_mosaic.version = 11 : i64} {
  func.func @kernel(%arg0: i32, %arg1: i32, %arg2: i32, %arg3: memref<1x128x128xbf16, #tpu.memory_space<vmem>>, %arg4: memref<1x128x128xbf16, #tpu.memory_space<vmem>>, %arg5: memref<128x128xbf16, #tpu.memory_space<vmem>>, %arg6: memref<1x128x128xf32, #tpu.memory_space<vmem>>, %arg7: memref<1x128x128xf32, #tpu.memory_space<vmem>>) attributes {dimension_semantics = [#tpu.dimension_semantics<parallel>, #tpu.dimension_semantics<parallel>, #tpu.dimension_semantics<arbitrary>], iteration_bounds = array<i64: 2, 1, 1>, scalar_prefetch = 0 : i64, scratch_operands = 1 : i64, tpu.core_type = #tpu.core_type<tc>, window_params = [{transform_indices = @transform_0, window_bounds = array<i64: 1, 128, 128>}, {transform_indices = @transform_1, window_bounds = array<i64: 1, 128, 128>}, {pipeline_mode = #tpu.pipeline_mode<synchronous>, transform_indices = @transform_2, window_bounds = array<i64: 128, 128>}, {transform_indices = @transform_3, window_bounds = array<i64: 1, 128, 128>}]} {
    %c0_i32 = arith.constant 0 : i32
    %0 = arith.cmpi eq, %arg2, %c0_i32 : i32
    %1 = arith.extui %0 : i1 to i32
    %c0_i32_0 = arith.constant 0 : i32
    %2 = arith.cmpi ne, %1, %c0_i32_0 : i32
    scf.if %2 {
      %cst_14 = arith.constant 0.000000e+00 : f32
      %12 = vector.broadcast %cst_14 : f32 to vector<1x128x128xf32>
      %c0_15 = arith.constant 0 : index
      %c0_16 = arith.constant 0 : index
      %c0_17 = arith.constant 0 : index
      %13 = vector.load %arg7[%c0_15, %c0_16, %c0_17] : memref<1x128x128xf32, #tpu.memory_space<vmem>>, vector<1x128x128xf32>
      tpu.vector_store %arg7[%c0_15, %c0_16, %c0_17], %12 {strides = array<i32>} : memref<1x128x128xf32, #tpu.memory_space<vmem>>, vector<1x128x128xf32>,
    } else {
    }
    %c0 = arith.constant 0 : index
    %c0_1 = arith.constant 0 : index
    %c0_2 = arith.constant 0 : index
    %3 = vector.load %arg7[%c0, %c0_1, %c0_2] : memref<1x128x128xf32, #tpu.memory_space<vmem>>, vector<1x128x128xf32>
    %c0_3 = arith.constant 0 : index
    %c0_4 = arith.constant 0 : index
    %c0_5 = arith.constant 0 : index
    %4 = vector.load %arg3[%c0_3, %c0_4, %c0_5] : memref<1x128x128xbf16, #tpu.memory_space<vmem>>, vector<1x128x128xbf16>
    %c0_6 = arith.constant 0 : index
    %c0_7 = arith.constant 0 : index
    %c0_8 = arith.constant 0 : index
    %5 = vector.load %arg4[%c0_6, %c0_7, %c0_8] : memref<1x128x128xbf16, #tpu.memory_space<vmem>>, vector<1x128x128xbf16>
    "tpu.trace_start"() <{level = 10 : i32, message = "bij,bjk->bik"}> : () -> ()
    %cst = arith.constant dense<0.000000e+00> : vector<1x128x128xf32>
    %6 = tpu.matmul %4, %5, %cst {dimension_numbers = #tpu.dot_dimension_numbers<[2], [1], [1], [2], [0, 0, 0, 1, 1, 2], [0], [0]>} : vector<1x128x128xbf16>, vector<1x128x128xbf16>, vector<1x128x128xf32> -> vector<1x128x128xf32>
    "tpu.trace_stop"() : () -> ()
    %7 = arith.addf %3, %6 : vector<1x128x128xf32>
    %c0_9 = arith.constant 0 : index
    %c0_10 = arith.constant 0 : index
    %c0_11 = arith.constant 0 : index
    %8 = vector.load %arg7[%c0_9, %c0_10, %c0_11] : memref<1x128x128xf32, #tpu.memory_space<vmem>>, vector<1x128x128xf32>
    tpu.vector_store %arg7[%c0_9, %c0_10, %c0_11], %7 {strides = array<i32>} : memref<1x128x128xf32, #tpu.memory_space<vmem>>, vector<1x128x128xf32>,
    %c0_i32_12 = arith.constant 0 : i32
    %9 = arith.cmpi eq, %arg2, %c0_i32_12 : i32
    %10 = arith.extui %9 : i1 to i32
    %c0_i32_13 = arith.constant 0 : i32
    %11 = arith.cmpi ne, %10, %c0_i32_13 : i32
    scf.if %11 {
      %c0_14 = arith.constant 0 : index
      %c0_15 = arith.constant 0 : index
      %c0_16 = arith.constant 0 : index
      %12 = vector.load %arg7[%c0_14, %c0_15, %c0_16] : memref<1x128x128xf32, #tpu.memory_space<vmem>>, vector<1x128x128xf32>
      %13 = vector.shape_cast %12 : vector<1x128x128xf32> to vector<128x128xf32>
      %14 = arith.truncf %13 : vector<128x128xf32> to vector<128x128xbf16>
      %c0_17 = arith.constant 0 : index
      %c0_18 = arith.constant 0 : index
      %15 = vector.load %arg5[%c0_17, %c0_18] : memref<128x128xbf16, #tpu.memory_space<vmem>>, vector<128x128xbf16>
      %cst_19 = arith.constant dense<0.000000e+00> : vector<128x128xf32>
      %16 = tpu.matmul %14, %15, %cst_19 {dimension_numbers = #tpu.dot_dimension_numbers<[1], [0], [0], [1], [0, 0, 1, 1], [], []>} : vector<128x128xbf16>, vector<128x128xbf16>, vector<128x128xf32> -> vector<128x128xf32>
      %17 = vector.shape_cast %16 : vector<128x128xf32> to vector<1x128x128xf32>
      %c0_20 = arith.constant 0 : index
      %c0_21 = arith.constant 0 : index
      %c0_22 = arith.constant 0 : index
      %18 = vector.load %arg6[%c0_20, %c0_21, %c0_22] : memref<1x128x128xf32, #tpu.memory_space<vmem>>, vector<1x128x128xf32>
      tpu.vector_store %arg6[%c0_20, %c0_21, %c0_22], %17 {strides = array<i32>} : memref<1x128x128xf32, #tpu.memory_space<vmem>>, vector<1x128x128xf32>,
    } else {
    }
    return
  }
  func.func @transform_0(%arg0: i32, %arg1: i32, %arg2: i32) -> (i32, i32, i32) {
    %c0_i32 = arith.constant 0 : i32
    return %arg0, %arg1, %arg2 : i32, i32, i32
  }
  func.func @transform_1(%arg0: i32, %arg1: i32, %arg2: i32) -> (i32, i32, i32) {
    %c0_i32 = arith.constant 0 : i32
    %c0_i32_0 = arith.constant 0 : i32
    return %arg0, %arg2, %c0_i32 : i32, i32, i32
  }
  func.func @transform_2(%arg0: i32, %arg1: i32, %arg2: i32) -> (i32, i32) {
    %c0_i32 = arith.constant 0 : i32
    %c0_i32_0 = arith.constant 0 : i32
    %c0_i32_1 = arith.constant 0 : i32
    return %c0_i32, %c0_i32_0 : i32, i32
  }
  func.func @transform_3(%arg0: i32, %arg1: i32, %arg2: i32) -> (i32, i32, i32) {
    %c0_i32 = arith.constant 0 : i32
    %c0_i32_0 = arith.constant 0 : i32
    return %arg0, %arg1, %c0_i32 : i32, i32, i32
  }
}

module attributes {stable_mosaic.version = 11 : i64} {
  func.func @kernel(%arg0: i32, %arg1: i32, %arg2: i32, %arg3: memref<1x128x128xbf16, #tpu.memory_space<vmem>>, %arg4: memref<1x128x128xbf16, #tpu.memory_space<vmem>>, %arg5: memref<128x128xbf16, #tpu.memory_space<vmem>>, %arg6: memref<1x128x128xf32, #tpu.memory_space<vmem>>, %arg7: memref<1x128x128xf32, #tpu.memory_space<vmem>>) attributes {dimension_semantics = [#tpu.dimension_semantics<parallel>, #tpu.dimension_semantics<parallel>, #tpu.dimension_semantics<arbitrary>], iteration_bounds = array<i64: 2, 1, 1>, scalar_prefetch = 0 : i64, scratch_operands = 1 : i64, tpu.core_type = #tpu.core_type<tc>, window_params = [{transform_indices = @transform_0, window_bounds = array<i64: 1, 128, 128>}, {transform_indices = @transform_1, window_bounds = array<i64: 1, 128, 128>}, {pipeline_mode = #tpu.pipeline_mode<synchronous>, transform_indices = @transform_2, window_bounds = array<i64: 128, 128>}, {transform_indices = @transform_3, window_bounds = array<i64: 1, 128, 128>}]} {
    %c0_i32 = arith.constant 0 : i32
    %0 = arith.cmpi eq, %arg2, %c0_i32 : i32
    %1 = arith.extui %0 : i1 to i32
    %c0_i32_0 = arith.constant 0 : i32
    %2 = arith.cmpi ne, %1, %c0_i32_0 : i32
    scf.if %2 {
      %cst_14 = arith.constant 0.000000e+00 : f32
      %12 = vector.broadcast %cst_14 : f32 to vector<1x128x128xf32>
      %c0_15 = arith.constant 0 : index
      %c0_16 = arith.constant 0 : index
      %c0_17 = arith.constant 0 : index
      %13 = vector.load %arg7[%c0_15, %c0_16, %c0_17] : memref<1x128x128xf32, #tpu.memory_space<vmem>>, vector<1x128x128xf32>
      tpu.vector_store %arg7[%c0_15, %c0_16, %c0_17], %12 {strides = array<i32>} : memref<1x128x128xf32, #tpu.memory_space<vmem>>, vector<1x128x128xf32>,
    } else {
    }
    %c0 = arith.constant 0 : index
    %c0_1 = arith.constant 0 : index
    %c0_2 = arith.constant 0 : index
    %3 = vector.load %arg7[%c0, %c0_1, %c0_2] : memref<1x128x128xf32, #tpu.memory_space<vmem>>, vector<1x128x128xf32>
    %c0_3 = arith.constant 0 : index
    %c0_4 = arith.constant 0 : index
    %c0_5 = arith.constant 0 : index
    %4 = vector.load %arg3[%c0_3, %c0_4, %c0_5] : memref<1x128x128xbf16, #tpu.memory_space<vmem>>, vector<1x128x128xbf16>
    %c0_6 = arith.constant 0 : index
    %c0_7 = arith.constant 0 : index
    %c0_8 = arith.constant 0 : index
    %5 = vector.load %arg4[%c0_6, %c0_7, %c0_8] : memref<1x128x128xbf16, #tpu.memory_space<vmem>>, vector<1x128x128xbf16>
    "tpu.trace_start"() <{level = 10 : i32, message = "bij,bjk->bik"}> : () -> ()
    %cst = arith.constant dense<0.000000e+00> : vector<1x128x128xf32>
    %6 = tpu.matmul %4, %5, %cst {dimension_numbers = #tpu.dot_dimension_numbers<[2], [1], [1], [2], [0, 0, 0, 1, 1, 2], [0], [0]>} : vector<1x128x128xbf16>, vector<1x128x128xbf16>, vector<1x128x128xf32> -> vector<1x128x128xf32>
    "tpu.trace_stop"() : () -> ()
    %7 = arith.addf %3, %6 : vector<1x128x128xf32>
    %c0_9 = arith.constant 0 : index
    %c0_10 = arith.constant 0 : index
    %c0_11 = arith.constant 0 : index
    %8 = vector.load %arg7[%c0_9, %c0_10, %c0_11] : memref<1x128x128xf32, #tpu.memory_space<vmem>>, vector<1x128x128xf32>
    tpu.vector_store %arg7[%c0_9, %c0_10, %c0_11], %7 {strides = array<i32>} : memref<1x128x128xf32, #tpu.memory_space<vmem>>, vector<1x128x128xf32>,
    %c0_i32_12 = arith.constant 0 : i32
    %9 = arith.cmpi eq, %arg2, %c0_i32_12 : i32
    %10 = arith.extui %9 : i1 to i32
    %c0_i32_13 = arith.constant 0 : i32
    %11 = arith.cmpi ne, %10, %c0_i32_13 : i32
    scf.if %11 {
      %c0_14 = arith.constant 0 : index
      %c0_15 = arith.constant 0 : index
      %c0_16 = arith.constant 0 : index
      %12 = vector.load %arg7[%c0_14, %c0_15, %c0_16] : memref<1x128x128xf32, #tpu.memory_space<vmem>>, vector<1x128x128xf32>
      %13 = vector.shape_cast %12 : vector<1x128x128xf32> to vector<128x128xf32>
      %14 = arith.truncf %13 : vector<128x128xf32> to vector<128x128xbf16>
      %c0_17 = arith.constant 0 : index
      %c0_18 = arith.constant 0 : index
      %15 = vector.load %arg5[%c0_17, %c0_18] : memref<128x128xbf16, #tpu.memory_space<vmem>>, vector<128x128xbf16>
      %cst_19 = arith.constant dense<0.000000e+00> : vector<128x128xf32>
      %16 = tpu.matmul %14, %15, %cst_19 {dimension_numbers = #tpu.dot_dimension_numbers<[1], [0], [0], [1], [0, 0, 1, 1], [], []>} : vector<128x128xbf16>, vector<128x128xbf16>, vector<128x128xf32> -> vector<128x128xf32>
      %17 = vector.shape_cast %16 : vector<128x128xf32> to vector<1x128x128xf32>
      %c0_20 = arith.constant 0 : index
      %c0_21 = arith.constant 0 : index
      %c0_22 = arith.constant 0 : index
      %18 = vector.load %arg6[%c0_20, %c0_21, %c0_22] : memref<1x128x128xf32, #tpu.memory_space<vmem>>, vector<1x128x128xf32>
      tpu.vector_store %arg6[%c0_20, %c0_21, %c0_22], %17 {strides = array<i32>} : memref<1x128x128xf32, #tpu.memory_space<vmem>>, vector<1x128x128xf32>,
    } else {
    }
    return
  }
  func.func @transform_0(%arg0: i32, %arg1: i32, %arg2: i32) -> (i32, i32, i32) {
    %c0_i32 = arith.constant 0 : i32
    return %arg0, %arg1, %arg2 : i32, i32, i32
  }
  func.func @transform_1(%arg0: i32, %arg1: i32, %arg2: i32) -> (i32, i32, i32) {
    %c0_i32 = arith.constant 0 : i32
    %c0_i32_0 = arith.constant 0 : i32
    return %arg0, %arg2, %c0_i32 : i32, i32, i32
  }
  func.func @transform_2(%arg0: i32, %arg1: i32, %arg2: i32) -> (i32, i32) {
    %c0_i32 = arith.constant 0 : i32
    %c0_i32_0 = arith.constant 0 : i32
    %c0_i32_1 = arith.constant 0 : i32
    return %c0_i32, %c0_i32_0 : i32, i32
  }
  func.func @transform_3(%arg0: i32, %arg1: i32, %arg2: i32) -> (i32, i32, i32) {
    %c0_i32 = arith.constant 0 : i32
    %c0_i32_0 = arith.constant 0 : i32
    return %arg0, %arg1, %c0_i32 : i32, i32, i32
  }
}

</mosaic_0001>

<bundles_post_ra>
// kernel: tpu_custom_call.1
= control target key start
LH: loop header
LB: loop body
LE: loop exit
PB: predicated region body
PF: predicated region fallthrough
CT: control target
= control target key end

     0   :  { %s1614_s0 = inlined_call_operand.hbm [shape: bf16[2,128,128], index: 0, kind: input, shape index: {}]   ;;  %s1615_s1 = inlined_call_operand.hbm [shape: bf16[2,128,128], index: 1, kind: input, shape index: {}]   ;;  %s1616_s2 = inlined_call_operand.hbm [shape: bf16[128,128], index: 2, kind: input, shape index: {}]   ;;  %s1617_s3 = inlined_call_operand.hbm [shape: f32[2,128,128], index: 3, kind: output, shape index: {}]  }
   0x1   :  { %1623 = sst [smem:[#allocation15_spill]] %s1616_s2 }
   0x2   :  { %8 = vsyncpa [#allocation4], 0 }
   0x3   :  { %10 = vsyncpa [#allocation4 + $0x1], 0 }
   0x4   :  { %11 = vsyncpa [#allocation7], 0 }
   0x5   :  { %13 = vsyncpa [#allocation7 + $0x1], 0 }
   0x6   :  { %14 = vsyncpa [#allocation5], 0 }
   0x7   :  { %16 = vsyncpa [#allocation5 + $0x1], 0  ;;  %s1368_s12 = smov 0   ;;  %s1370_s13 = smov 0  }
   0x8   :  { %s1372_s14 = smov 0   ;;  %s1374_s15 = smov 0  }
   0x9   :  { %s1376_s16 = smov 0   ;;  %s1378_s17 = smov 0  }
   0xa LB: > { %s1399_s18 = sadd.s32 4294967295, %s1338_s17   ;;  %s919_s19 = sadd.s32 4294967294, %s1338_s17   ;;  %s1338_s17 = sphi %s1378_s17, %s22_s17   ;;  %s1334_s16 = sphi %s1376_s16, %s1643_s16   ;;  %s1330_s15 = sphi %s1374_s15, %s1642_s15   ;;  %s1326_s14 = sphi %s1372_s14, %s1641_s14   ;;  %s1322_s13 = sphi %s1370_s13, %s1640_s13   ;;  %s1318_s12 = sphi %s1368_s12, %s1639_s12  }
   0xb   : > { %p65_p0 = scmp.ne.s32.totalorder %s1322_s13, %s1318_s12  ;;  %p66_p1 = scmp.eq.s32.totalorder %s1399_s18, 0 }
   0xc   : > { %p146_p3 = scmp.eq.s32.totalorder %s919_s19, 1  ;;  %p920_p5 = scmp.ge.s32.totalorder %s1338_s17, 1 }
   0xd   : > { %p1408_p4 = por %p66_p1, %p65_p0  ;;  %p153_p7 = scmp.lt.s32.totalorder %s1338_s17, 3 }
   0xe   : > { %p1413_p6 = por %p146_p3, %p65_p0  ;;  %s1340_s23 = smov [#allocation8]  }
   0xf   : > { %p1418_p8 = pnand %p920_p5, %p153_p7  ;;  %s165_s24 = sshll.u32 %s1340_s23, 4  ;;  %s166_s24 = int_to_ptr.vmem [resolvable:$true] %s165_s24 }
  0x10   : > { %s1625_s21 = scalar_select %p1413_p6, 1, 0 }
  0x11   : > { %p1072_p9 = pneg %p1418_p8  ;;  %s41_s26 = sadd.s32 1, %s1334_s16 }
  0x12   : > { %s1179_s27 = scalar_lea.vmem %s166_s24, 1024  ;;  %p1187_p5 = scmp.lt.s32.totalorder %s166_s24, %s166_s24 }
  0x13   : > { %p1427_p11 = pnand %p1072_p9, %p66_p1  ;;  %p1180_p13 = scmp.ne.s32.totalorder %s166_s24, %s1179_s27 }
  0x14   : > { %p1188_p7 = scmp.lt.s32.totalorder %s1179_s27, %s1179_s27 }
  0x15   : > { %p1170_p12 = pneg %p1427_p11 }
  0x16   : > { %p1189_p2 = por %p1188_p7, %p1187_p5 }
  0x17   : > { %p1182_p0 = pnand %p1180_p13, %p1170_p12 }
  0x19   : > { %p1183_p3 = pneg %p1182_p0 }
  0x1b   : > { %p1190_p6 = pnand %p1189_p2, %p1183_p3 }
  0x1d   : > { %1193 = shalt.err (!%p1190_p6)
}
  0x1e   : > { %s1618_s28 = smov 64   ;;  %s1620_s29 = smov 4  }
  0x1f   : > { %s1628_s2 = sld [smem:[#allocation15_spill]]  ;;  %p43_p2 = scmp.ge.s32.totalorder %s41_s26, 2 }
  0x20   : > { %s52_s5 = sadd.s32 1, %s1326_s14  ;;  %p59_p6 = scmp.ne.s32.totalorder %s1326_s14, %s1322_s13 }
  0x21   : > { %p60_p9 = scmp.eq.s32.totalorder %s1338_s17, 0  ;;  %s1645_s26 = smov (%p43_p2, %s41_s26), 0 }
  0x22   : > { %1629 = sst [smem:[#allocation14_spill]] %s1645_s26  ;;  %p1631_p13 = scmp.eq.s32.totalorder %s1399_s18, 1 }
  0x23   : > { %p1448_p12 = por %p60_p9, %p59_p6  ;;  %s45_s8 = ssub.s32 %s1334_s16, %s1645_s26 }
  0x24   : > { %p1454_p0 = por %p1631_p13, %p59_p6  ;;  %p1088_p3 = scmp.lt.s32.totalorder %s1338_s17, 2 }
  0x25   : > { %1075 = dma.hbm_to_vmem [thread:$0]  (!%p1427_p11), %s1628_s2, 1024, %s166_s24, [#allocation7], %s1618_s28, %s1618_s28, %s1620_s29  }
  0x26   : > { %p50_p11 = scmp.eq.s32.totalorder %s45_s8, 0  ;;  %s179_s9 = sand.u32 1, %s1326_s14  }
  0x27   : > { %s923_s10 = sshll.u32 %s179_s9, 6  ;;  %s963_s19 = sshll.u32 %s1334_s16, 10 }
  0x28   : > { %s1463_s11 = scalar_select %p50_p11, %s1326_s14, %s52_s5  }
  0x29   : > { %s192_s25 = scalar_lea.hbm %s1614_s0, %s963_s19  ;;  %s183_s27 = scalar_lea.vmem [#allocation3], %s923_s10 }
  0x2a   : > { %s193_s30 = sshll.u32 %s183_s27, 4  ;;  %p1471_p5 = pnand %p1088_p3, %p1448_p12  ;;  %s194_s30 = int_to_ptr.vmem [resolvable:$true] %s193_s30 }
  0x2b   : > { %s1478_s5 = scalar_lea.hbm %s1615_s1, %s963_s19  ;;  %s207_s8 = scalar_lea.vmem [#allocation6], %s923_s10 }
  0x2c   : > { %s216_s2 = sshll.u32 %s207_s8, 4  ;;  %s180_s26 = scalar_lea.sflag [#allocation4], %s179_s9  ;;  %s217_s2 = int_to_ptr.vmem [resolvable:$true] %s216_s2 }
  0x2d   : > { %p1196_p7 = pneg %p1471_p5  ;;  %s1207_s23 = scalar_lea.vmem %s194_s30, 1024 }
  0x2e   : > { %p1208_p2 = scmp.ne.s32.totalorder %s194_s30, %s1207_s23  ;;  %s1343_s6 = smov [#allocation3]  }
  0x2f   : > { %s1212_s24 = sshll.u32 %s1343_s6, 4  ;;  %s1213_s24 = int_to_ptr.vmem [resolvable:$false] %s1212_s24 }
  0x30   : > { %p1210_p6 = pnand %p1208_p2, %p1196_p7  ;;  %s1214_s27 = scalar_lea.vmem %s1213_s24, 2048 }
  0x31   : > { %p1215_p12 = scmp.lt.s32.totalorder %s194_s30, %s1213_s24  ;;  %p1216_p13 = scmp.lt.s32.totalorder %s1214_s27, %s1207_s23 }
  0x32   : > { %p1211_p9 = pneg %p1210_p6 }
  0x33   : > { %p1217_p3 = por %p1216_p13, %p1215_p12 }
  0x35   : > { %p1218_p11 = pnand %p1217_p3, %p1211_p9 }
  0x37   : > { %1221 = shalt.err (!%p1218_p11)
}
  0x38   : > { %s1634_s28 = smov 4   ;;  %s1635_s29 = smov 64  }
  0x39   : > { %1079 = dma.hbm_to_vmem [thread:$0]  (!%p1471_p5), %s192_s25, 1024, %s194_s30, %s180_s26, %s1635_s29, %s1635_s29, %s1634_s28  }
  0x3a   : > { %s203_s9 = sand.u32 1, %s1338_s17   ;;  %s1235_s19 = scalar_lea.vmem %s217_s2, 1024 }
  0x3b   : > { %s204_s10 = scalar_lea.sflag [#allocation7], %s203_s9  ;;  %p1236_p2 = scmp.ne.s32.totalorder %s217_s2, %s1235_s19 }
  0x3c   : > { %s1344_s8 = smov [#allocation6]  }
  0x3d   : > { %p1238_p6 = pnand %p1236_p2, %p1196_p7  ;;  %s1240_s23 = sshll.u32 %s1344_s8, 4  ;;  %s1241_s23 = int_to_ptr.vmem [resolvable:$false] %s1240_s23 }
  0x3e   : > { %s1242_s6 = scalar_lea.vmem %s1241_s23, 2048  ;;  %p1243_p9 = scmp.lt.s32.totalorder %s217_s2, %s1241_s23 }
  0x3f   : > { %p1239_p10 = pneg %p1238_p6  ;;  %p1244_p12 = scmp.lt.s32.totalorder %s1242_s6, %s1235_s19 }
  0x41   : > { %p1245_p13 = por %p1244_p12, %p1243_p9 }
  0x43   : > { %p1246_p3 = pnand %p1245_p13, %p1239_p10 }
  0x45   : > { %1249 = shalt.err (!%p1246_p3)
}
  0x46   : > { %1082 = dma.hbm_to_vmem [thread:$0]  (!%p1471_p5), %s1478_s5, 1024, %s217_s2, %s204_s10, %s1635_s29, %s1635_s29, %s1634_s28  }
  0x47   : > { %228 = sbr.rel (%p1418_p8) target bundleno = 554 (0x22a), region = 32  ;;  %s1503_s26 = sand.u32 (!%p1418_p8), 1, %s1322_s13  }
  0x48   : > { %s930_s25 = sshll.u32 (!%p1418_p8), %s1503_s26, 6  ;;  %s231_s30 = scalar_lea.sflag (!%p1418_p8), [#allocation4], %s1503_s26 }
  0x49   : > { %s1507_s24 = scalar_lea.vmem (!%p1418_p8), [#allocation3], %s930_s25 }
  0x4c   : > { %1301 = dma.done.wait (%p1408_p4), %s231_s30, 1024  }
  0x4d   : > { %1303 = vsyncadd (%p1408_p4), %s231_s30, 4294966272  ;;  %s239_s2 = sand.u32 1, %s1399_s18   ;;  %s1514_s4 = scalar_lea.vmem [#allocation6], %s930_s25 }
  0x4e   : > { %s240_s22 = scalar_lea.sflag [#allocation7], %s239_s2 }
  0x4f   : > { %1305 = dma.done.wait (%p1408_p4), %s240_s22, 1024  }
  0x50   : > { %1307 = vsyncadd (%p1408_p4), %s240_s22, 4294966272 }
  0x51   : > { %1309 = dma.done.wait (%p66_p1), [#allocation7], 1024  }
  0x52   : > { %1311 = vsyncadd (%p66_p1), [#allocation7], 4294966272  ;;  %v1144_v0 = vld [vmem:[%s1514_s4 + $0x38] sm:$0xff]   ;;  %v1145_v1 = vld [vmem:[%s1514_s4 + $0x30] sm:$0xff]   ;;  %s933_s18 = sshll.u32 %s1503_s26, 7  ;;  %s965_s5 = sshll.u32 %s1330_s15, 11 }
  0x53   : > { %998 = vmatprep.subr.bf16.mxu0 %v1144_v0  ;;  %v1146_v2 = vld [vmem:[%s1514_s4 + $0x28] sm:$0xff]   ;;  %v1147_v3 = vld [vmem:[%s1514_s4 + $0x20] sm:$0xff]   ;;  %v1148_v5 = vld [vmem:[%s1514_s4 + $0x18] sm:$0xff]   ;;  %s1541_s20 = scalar_lea.vmem [#allocation9], %s933_s18  ;;  %s1562_s9 = scalar_lea.hbm %s1617_s3, %s965_s5 }
  0x54   : > { %999 = vmatpush3.bf16.msra.mxu0 %v1144_v0  ;;  %v1152_v4 = vld [vmem:[%s1507_s24] sm:$0xff]   ;;  %v1149_v6 = vld [vmem:[%s1514_s4 + $0x10] sm:$0xff]   ;;  %v1160_v7 = vld [vmem:[#allocation8 + $0x38] sm:$0xff]   ;;  %s792_s27 = sshll.u32 %s1541_s20, 4  ;;  %s777_s10 = scalar_lea.sflag [#allocation5], %s1503_s26  ;;  %s1564_s27 = int_to_ptr.vmem [resolvable:$true] %s792_s27 }
  0x55   : > { %1000 = vmatprep.subr.bf16.mxu0 %v1145_v1  ;;  %1014 = vmatprep.mubr.bf16.mxu0 %v1152_v4  ;;  %v1161_v8 = vld [vmem:[#allocation8 + $0x30] sm:$0xff]   ;;  %v1150_v9 = vld [vmem:[%s1514_s4 + $0x8] sm:$0xff]   ;;  %v1151_v11 = vld [vmem:[%s1514_s4] sm:$0xff]   ;;  %s1250_s19 = scalar_lea.vmem %s1564_s27, 2048  ;;  %s1345_s15 = smov [#allocation9]  }
  0x56   : > { %1030 = vmatprep.subr.bf16.mxu1 %v1160_v7  ;;  %v1162_v10 = vld [vmem:[#allocation8 + $0x28] sm:$0xff]   ;;  %v1163_v12 = vld [vmem:[#allocation8 + $0x20] sm:$0xff]   ;;  %v1164_v13 = vld [vmem:[#allocation8 + $0x18] sm:$0xff]   ;;  %p1251_p1 = scmp.ne.s32.totalorder %s1564_s27, %s1250_s19  ;;  %s1254_s8 = sshll.u32 %s1345_s15, 4  ;;  %s1255_s8 = int_to_ptr.vmem [resolvable:$false] %s1254_s8 }
  0x57   : > { %1031 = vmatpush3.bf16.msra.mxu1 %v1160_v7  ;;  %v1153_v14 = vld [vmem:[%s1507_s24 + $0x8] sm:$0xff]   ;;  %v1154_v15 = vld [vmem:[%s1507_s24 + $0x10] sm:$0xff]   ;;  %v1155_v17 = vld [vmem:[%s1507_s24 + $0x18] sm:$0xff]   ;;  %s1256_s23 = scalar_lea.vmem %s1255_s8, 4096  ;;  %p1257_p10 = scmp.lt.s32.totalorder %s1564_s27, %s1255_s8 }
  0x58   : > { %1001 = vmatpush3.bf16.msra.mxu0 %v1145_v1  ;;  %1032 = vmatprep.subr.bf16.mxu1 %v1161_v8  ;;  %v1165_v16 = vld [vmem:[#allocation8 + $0x10] sm:$0xff]   ;;  %v1156_v18 = vld [vmem:[%s1507_s24 + $0x20] sm:$0xff]   ;;  %v1157_v19 = vld [vmem:[%s1507_s24 + $0x28] sm:$0xff]   ;;  %p1252_p4 = pnand %p1251_p1, %p1454_p0  ;;  %p1258_p5 = scmp.lt.s32.totalorder %s1256_s23, %s1250_s19 }
  0x59   : > { %1002 = vmatprep.subr.bf16.mxu0 %v1146_v2  ;;  %v1158_v20 = vld [vmem:[%s1507_s24 + $0x30] sm:$0xff]   ;;  %v1159_v21 = vld [vmem:[%s1507_s24 + $0x38] sm:$0xff]   ;;  %v1166_v22 = vld [vmem:[#allocation8 + $0x8] sm:$0xff]  }
  0x5a   : > { %v1167_v23 = vld [vmem:[#allocation8] sm:$0xff]   ;;  %p1253_p8 = pneg %p1252_p4  ;;  %p1259_p7 = por %p1258_p5, %p1257_p10 }
  0x5b   : > { %1033 = vmatpush3.bf16.msra.mxu1 %v1161_v8 }
  0x5c   : > { %1003 = vmatpush3.bf16.msra.mxu0 %v1146_v2  ;;  %1034 = vmatprep.subr.bf16.mxu1 %v1162_v10  ;;  %p1260_p11 = pnand %p1259_p7, %p1253_p8 }
  0x5d   : > { %1004 = vmatprep.subr.bf16.mxu0 %v1147_v3 }
  0x5f   : > { %1035 = vmatpush3.bf16.msra.mxu1 %v1162_v10 }
  0x60   : > { %1005 = vmatpush3.bf16.msra.mxu0 %v1147_v3  ;;  %1036 = vmatprep.subr.bf16.mxu1 %v1163_v12 }
  0x61   : > { %1006 = vmatprep.subr.bf16.mxu0 %v1148_v5 }
  0x63   : > { %1037 = vmatpush3.bf16.msra.mxu1 %v1163_v12 }
  0x64   : > { %1007 = vmatpush3.bf16.msra.mxu0 %v1148_v5  ;;  %1038 = vmatprep.subr.bf16.mxu1 %v1164_v13 }
  0x65   : > { %1008 = vmatprep.subr.bf16.mxu0 %v1149_v6 }
  0x67   : > { %1039 = vmatpush3.bf16.msra.mxu1 %v1164_v13 }
  0x68   : > { %1009 = vmatpush3.bf16.msra.mxu0 %v1149_v6  ;;  %1040 = vmatprep.subr.bf16.mxu1 %v1165_v16 }
  0x69   : > { %1010 = vmatprep.subr.bf16.mxu0 %v1150_v9 }
  0x6b   : > { %1041 = vmatpush3.bf16.msra.mxu1 %v1165_v16 }
  0x6c   : > { %1011 = vmatpush3.bf16.msra.mxu0 %v1150_v9  ;;  %1042 = vmatprep.subr.bf16.mxu1 %v1166_v22 }
  0x6d   : > { %1012 = vmatprep.subr.bf16.mxu0 %v1151_v11 }
  0x6f   : > { %1043 = vmatpush3.bf16.msra.mxu1 %v1166_v22 }
  0x70   : > { %1013 = vmatpush3.bf16.msra.mxu0 %v1151_v11  ;;  %1044 = vmatprep.subr.bf16.mxu1 %v1167_v23 }
  0x73   : > { %1015 = vmatmul.mubr.bf16.vlgmr.msra.gmra.mxu0 %v1153_v14  ;;  %1045 = vmatpush3.bf16.msra.mxu1 %v1167_v23 }
  0x74   : > { %1018 = vmatprep.mubr.bf16.mxu0 %v1154_v15 }
  0x7b   : > { %1019 = vmatmul.mubr.bf16.gmra.mxu0 %v1155_v17 }
  0x7c   : > { %1022 = vmatprep.mubr.bf16.mxu0 %v1156_v18 }
  0x83   : > { %1023 = vmatmul.mubr.bf16.gmra.mxu0 %v1157_v19 }
  0x84   : > { %1026 = vmatprep.mubr.bf16.mxu0 %v1158_v20 }
  0x8b   : > { %1027 = vmatmul.mubr.bf16.gmra.mxu0 %v1159_v21 }
 0x133   : > { %v1016_v24 = vpop.f32.mrf.mxu0 }
 0x135   : > { %v477_v25 = vpop.f32.mrf.mxu0 }
 0x137   : > { %v1017_v26 = vpop.f32.mrf.mxu0 }
 0x138   : > { %v592_v29 = vpack.c.bf16 %v1017_v26, %v1016_v24 }
 0x139   : > { %v480_v27 = vpop.f32.mrf.mxu0 }
 0x13a   : > { %v591_v28 = vpack.c.bf16 %v480_v27, %v477_v25 }
 0x13b   : > { %v1020_v30 = vpop.f32.mrf.mxu0 }
 0x13c   : > { %1046 = vmatprep.mubr.bf16.mxu1 %v591_v28 }
 0x13d   : > { %v493_v31 = vpop.f32.mrf.mxu0  ;;  %1047 = vmatmul.mubr.bf16.vlgmr.msra.gmra.mxu1 %v592_v29 }
 0x13f   : > { %v1021_v32 = vpop.f32.mrf.mxu0 }
 0x140   : > { %v594_v35 = vpack.c.bf16 %v1021_v32, %v1020_v30 }
 0x141   : > { %v496_v33 = vpop.f32.mrf.mxu0 }
 0x142   : > { %v593_v34 = vpack.c.bf16 %v496_v33, %v493_v31 }
 0x143   : > { %v1024_v36 = vpop.f32.mrf.mxu0 }
 0x144   : > { %1050 = vmatprep.mubr.bf16.mxu1 %v593_v34 }
 0x145   : > { %v509_v37 = vpop.f32.mrf.mxu0  ;;  %1051 = vmatmul.mubr.bf16.gmra.mxu1 %v594_v35 }
 0x147   : > { %v1025_v38 = vpop.f32.mrf.mxu0 }
 0x148   : > { %v596_v41 = vpack.c.bf16 %v1025_v38, %v1024_v36 }
 0x149   : > { %v512_v39 = vpop.f32.mrf.mxu0 }
 0x14a   : > { %v595_v40 = vpack.c.bf16 %v512_v39, %v509_v37 }
 0x14b   : > { %v1028_v42 = vpop.f32.mrf.mxu0 }
 0x14c   : > { %1054 = vmatprep.mubr.bf16.mxu1 %v595_v40 }
 0x14d   : > { %v525_v43 = vpop.f32.mrf.mxu0  ;;  %1055 = vmatmul.mubr.bf16.gmra.mxu1 %v596_v41 }
 0x14f   : > { %v1029_v44 = vpop.f32.mrf.mxu0 }
 0x150   : > { %v598_v47 = vpack.c.bf16 %v1029_v44, %v1028_v42 }
 0x151   : > { %v528_v45 = vpop.f32.mrf.mxu0 }
 0x152   : > { %v597_v46 = vpack.c.bf16 %v528_v45, %v525_v43 }
 0x154   : > { %1058 = vmatprep.mubr.bf16.mxu1 %v597_v46 }
 0x155   : > { %1059 = vmatmul.mubr.bf16.gmra.mxu1 %v598_v47 }
 0x1fd   : > { %v1048_v48 = vpop.f32.mrf.mxu1 }
 0x1fe   : > { %762 = vst [vmem:[%s1541_s20 + $0x10] sm:$0xff] %v1048_v48 }
 0x1ff   : > { %v697_v49 = vpop.f32.mrf.mxu1 }
 0x200   : > { %760 = vst [vmem:[%s1541_s20] sm:$0xff] %v697_v49 }
 0x201   : > { %v1049_v50 = vpop.f32.mrf.mxu1 }
 0x202   : > { %763 = vst [vmem:[%s1541_s20 + $0x18] sm:$0xff] %v1049_v50 }
 0x203   : > { %v700_v51 = vpop.f32.mrf.mxu1 }
 0x204   : > { %761 = vst [vmem:[%s1541_s20 + $0x8] sm:$0xff] %v700_v51 }
 0x205   : > { %v1052_v52 = vpop.f32.mrf.mxu1 }
 0x206   : > { %766 = vst [vmem:[%s1541_s20 + $0x30] sm:$0xff] %v1052_v52 }
 0x207   : > { %v713_v53 = vpop.f32.mrf.mxu1 }
 0x208   : > { %764 = vst [vmem:[%s1541_s20 + $0x20] sm:$0xff] %v713_v53 }
 0x209   : > { %v1053_v54 = vpop.f32.mrf.mxu1 }
 0x20a   : > { %767 = vst [vmem:[%s1541_s20 + $0x38] sm:$0xff] %v1053_v54 }
 0x20b   : > { %v716_v55 = vpop.f32.mrf.mxu1 }
 0x20c   : > { %765 = vst [vmem:[%s1541_s20 + $0x28] sm:$0xff] %v716_v55 }
 0x20d   : > { %v1056_v56 = vpop.f32.mrf.mxu1 }
 0x20e   : > { %770 = vst [vmem:[%s1541_s20 + $0x50] sm:$0xff] %v1056_v56 }
 0x20f   : > { %v729_v57 = vpop.f32.mrf.mxu1 }
 0x210   : > { %768 = vst [vmem:[%s1541_s20 + $0x40] sm:$0xff] %v729_v57 }
 0x211   : > { %v1057_v58 = vpop.f32.mrf.mxu1 }
 0x212   : > { %771 = vst [vmem:[%s1541_s20 + $0x58] sm:$0xff] %v1057_v58 }
 0x213   : > { %v732_v59 = vpop.f32.mrf.mxu1 }
 0x214   : > { %769 = vst [vmem:[%s1541_s20 + $0x48] sm:$0xff] %v732_v59 }
 0x215   : > { %v1060_v60 = vpop.f32.mrf.mxu1 }
 0x216   : > { %774 = vst [vmem:[%s1541_s20 + $0x70] sm:$0xff] %v1060_v60 }
 0x217   : > { %v745_v61 = vpop.f32.mrf.mxu1 }
 0x218   : > { %772 = vst [vmem:[%s1541_s20 + $0x60] sm:$0xff] %v745_v61 }
 0x219   : > { %v1061_v62 = vpop.f32.mrf.mxu1 }
 0x21a   : > { %775 = vst [vmem:[%s1541_s20 + $0x78] sm:$0xff] %v1061_v62 }
 0x21b   : > { %v748_v63 = vpop.f32.mrf.mxu1 }
 0x21c   : > { %773 = vst [vmem:[%s1541_s20 + $0x68] sm:$0xff] %v748_v63 }
 0x21d   : > { %1263 = shalt.err (!%p1260_p11)
}
 0x21e   : > { %s1264_s6 = scalar_lea.hbm %s1562_s9, 2048  ;;  %s1268_s24 = scalar_lea.hbm %s1617_s3, 4096 }
 0x21f   : > { %p1265_p2 = scmp.ne.s32.totalorder %s1562_s9, %s1264_s6  ;;  %p1269_p12 = scmp.lt.s32.totalorder %s1562_s9, %s1617_s3 }
 0x220   : > { %p1270_p13 = scmp.lt.s32.totalorder %s1268_s24, %s1264_s6 }
 0x221   : > { %p1266_p6 = pnand %p1265_p2, %p1454_p0 }
 0x222   : > { %p1271_p3 = por %p1270_p13, %p1269_p12 }
 0x223   : > { %p1267_p9 = pneg %p1266_p6 }
 0x225   : > { %p1272_p1 = pnand %p1271_p3, %p1267_p9 }
 0x227   : > { %1275 = shalt.err (!%p1272_p1)
}
 0x228   : > { %s1346_s4 = smov 128   ;;  %s1347_s18 = smov 8  }
 0x229   : > { %1070 = dma.vmem_to_hbm [thread:$0]  (%p1454_p0), %s1564_s27, 2048, %s1562_s9, %s777_s10, %s1346_s4, %s1346_s4, %s1347_s18  }
 0x22a PF: > { %s807_s20 = sand.u32 1, %s1318_s12   ;;  %p1636_p4 = scmp.ne.s32.totalorder %s1625_s21, 0 }
 0x22b   : > { %p1637_p8 = scmp.ge.s32.totalorder %s1338_s17, 2  ;;  %s808_s5 = scalar_lea.sflag [#allocation5], %s807_s20 }
 0x22d   : > { %p1084_p10 = pnand %p1637_p8, %p1636_p4 }
 0x22f   : > { %p1085_p5 = pneg %p1084_p10 }
 0x231   : > { %1313 = dma.done.wait (%p1085_p5), %s808_s5, 2048  }
 0x232   : > { %1315 = vsyncadd (%p1085_p5), %s808_s5, 4294965248  ;;  %s22_s17 = sadd.s32 1, %s1338_s17   ;;  %s1638_s7 = sld [smem:[#allocation14_spill]] }
 0x233   : > { %p19_p7 = scmp.ge.s32.totalorder %s22_s17, 4   ;;  %s1639_s12 = smov %s1322_s13 }
 0x234   : > { %s1640_s13 = smov %s1326_s14  ;;  %s1641_s14 = smov %s1463_s11 }
 0x235   : > { %s1642_s15 = smov %s1334_s16  ;;  %21 = sbr.rel (!%p19_p7) target bundleno = 10 (0xa), region = 102 }
 0x238   : > { %s1643_s16 = smov %s1638_s7 }
 0x23a   :  { %813 = vsyncpa [#allocation4], 1 }
 0x23b   :  { %815 = vsyncpa [#allocation4 + $0x1], 1 }
 0x23c   :  { %816 = vsyncpa [#allocation7], 1 }
 0x23d   :  { %818 = vsyncpa [#allocation7 + $0x1], 1 }
 0x23e   :  { %819 = vsyncpa [#allocation5], 1 }
 0x23f   :  { %821 = vsyncpa [#allocation5 + $0x1], 1 }

// kernel: tpu_custom_call.1
= control target key start
LH: loop header
LB: loop body
LE: loop exit
PB: predicated region body
PF: predicated region fallthrough
CT: control target
= control target key end

     0   :  { %s1614_s0 = inlined_call_operand.hbm [shape: bf16[2,128,128], index: 0, kind: input, shape index: {}]   ;;  %s1615_s1 = inlined_call_operand.hbm [shape: bf16[2,128,128], index: 1, kind: input, shape index: {}]   ;;  %s1616_s2 = inlined_call_operand.hbm [shape: bf16[128,128], index: 2, kind: input, shape index: {}]   ;;  %s1617_s3 = inlined_call_operand.hbm [shape: f32[2,128,128], index: 3, kind: output, shape index: {}]  }
   0x1   :  { %1623 = sst [smem:[#allocation15_spill]] %s1616_s2 }
   0x2   :  { %8 = vsyncpa [#allocation4], 0 }
   0x3   :  { %10 = vsyncpa [#allocation4 + $0x1], 0 }
   0x4   :  { %11 = vsyncpa [#allocation7], 0 }
   0x5   :  { %13 = vsyncpa [#allocation7 + $0x1], 0 }
   0x6   :  { %14 = vsyncpa [#allocation5], 0 }
   0x7   :  { %16 = vsyncpa [#allocation5 + $0x1], 0  ;;  %s1368_s12 = smov 0   ;;  %s1370_s13 = smov 0  }
   0x8   :  { %s1372_s14 = smov 0   ;;  %s1374_s15 = smov 0  }
   0x9   :  { %s1376_s16 = smov 0   ;;  %s1378_s17 = smov 0  }
   0xa LB: > { %s1399_s18 = sadd.s32 4294967295, %s1338_s17   ;;  %s919_s19 = sadd.s32 4294967294, %s1338_s17   ;;  %s1338_s17 = sphi %s1378_s17, %s22_s17   ;;  %s1334_s16 = sphi %s1376_s16, %s1643_s16   ;;  %s1330_s15 = sphi %s1374_s15, %s1642_s15   ;;  %s1326_s14 = sphi %s1372_s14, %s1641_s14   ;;  %s1322_s13 = sphi %s1370_s13, %s1640_s13   ;;  %s1318_s12 = sphi %s1368_s12, %s1639_s12  }
   0xb   : > { %p65_p0 = scmp.ne.s32.totalorder %s1322_s13, %s1318_s12  ;;  %p66_p1 = scmp.eq.s32.totalorder %s1399_s18, 0 }
   0xc   : > { %p146_p3 = scmp.eq.s32.totalorder %s919_s19, 1  ;;  %p920_p5 = scmp.ge.s32.totalorder %s1338_s17, 1 }
   0xd   : > { %p1408_p4 = por %p66_p1, %p65_p0  ;;  %p153_p7 = scmp.lt.s32.totalorder %s1338_s17, 3 }
   0xe   : > { %p1413_p6 = por %p146_p3, %p65_p0  ;;  %s1340_s23 = smov [#allocation8]  }
   0xf   : > { %p1418_p8 = pnand %p920_p5, %p153_p7  ;;  %s165_s24 = sshll.u32 %s1340_s23, 4  ;;  %s166_s24 = int_to_ptr.vmem [resolvable:$true] %s165_s24 }
  0x10   : > { %s1625_s21 = scalar_select %p1413_p6, 1, 0 }
  0x11   : > { %p1072_p9 = pneg %p1418_p8  ;;  %s41_s26 = sadd.s32 1, %s1334_s16 }
  0x12   : > { %s1179_s27 = scalar_lea.vmem %s166_s24, 1024  ;;  %p1187_p5 = scmp.lt.s32.totalorder %s166_s24, %s166_s24 }
  0x13   : > { %p1427_p11 = pnand %p1072_p9, %p66_p1  ;;  %p1180_p13 = scmp.ne.s32.totalorder %s166_s24, %s1179_s27 }
  0x14   : > { %p1188_p7 = scmp.lt.s32.totalorder %s1179_s27, %s1179_s27 }
  0x15   : > { %p1170_p12 = pneg %p1427_p11 }
  0x16   : > { %p1189_p2 = por %p1188_p7, %p1187_p5 }
  0x17   : > { %p1182_p0 = pnand %p1180_p13, %p1170_p12 }
  0x19   : > { %p1183_p3 = pneg %p1182_p0 }
  0x1b   : > { %p1190_p6 = pnand %p1189_p2, %p1183_p3 }
  0x1d   : > { %1193 = shalt.err (!%p1190_p6)
}
  0x1e   : > { %s1618_s28 = smov 64   ;;  %s1620_s29 = smov 4  }
  0x1f   : > { %s1628_s2 = sld [smem:[#allocation15_spill]]  ;;  %p43_p2 = scmp.ge.s32.totalorder %s41_s26, 2 }
  0x20   : > { %s52_s5 = sadd.s32 1, %s1326_s14  ;;  %p59_p6 = scmp.ne.s32.totalorder %s1326_s14, %s1322_s13 }
  0x21   : > { %p60_p9 = scmp.eq.s32.totalorder %s1338_s17, 0  ;;  %s1645_s26 = smov (%p43_p2, %s41_s26), 0 }
  0x22   : > { %1629 = sst [smem:[#allocation14_spill]] %s1645_s26  ;;  %p1631_p13 = scmp.eq.s32.totalorder %s1399_s18, 1 }
  0x23   : > { %p1448_p12 = por %p60_p9, %p59_p6  ;;  %s45_s8 = ssub.s32 %s1334_s16, %s1645_s26 }
  0x24   : > { %p1454_p0 = por %p1631_p13, %p59_p6  ;;  %p1088_p3 = scmp.lt.s32.totalorder %s1338_s17, 2 }
  0x25   : > { %1075 = dma.hbm_to_vmem [thread:$0]  (!%p1427_p11), %s1628_s2, 1024, %s166_s24, [#allocation7], %s1618_s28, %s1618_s28, %s1620_s29  }
  0x26   : > { %p50_p11 = scmp.eq.s32.totalorder %s45_s8, 0  ;;  %s179_s9 = sand.u32 1, %s1326_s14  }
  0x27   : > { %s923_s10 = sshll.u32 %s179_s9, 6  ;;  %s963_s19 = sshll.u32 %s1334_s16, 10 }
  0x28   : > { %s1463_s11 = scalar_select %p50_p11, %s1326_s14, %s52_s5  }
  0x29   : > { %s192_s25 = scalar_lea.hbm %s1614_s0, %s963_s19  ;;  %s183_s27 = scalar_lea.vmem [#allocation3], %s923_s10 }
  0x2a   : > { %s193_s30 = sshll.u32 %s183_s27, 4  ;;  %p1471_p5 = pnand %p1088_p3, %p1448_p12  ;;  %s194_s30 = int_to_ptr.vmem [resolvable:$true] %s193_s30 }
  0x2b   : > { %s1478_s5 = scalar_lea.hbm %s1615_s1, %s963_s19  ;;  %s207_s8 = scalar_lea.vmem [#allocation6], %s923_s10 }
  0x2c   : > { %s216_s2 = sshll.u32 %s207_s8, 4  ;;  %s180_s26 = scalar_lea.sflag [#allocation4], %s179_s9  ;;  %s217_s2 = int_to_ptr.vmem [resolvable:$true] %s216_s2 }
  0x2d   : > { %p1196_p7 = pneg %p1471_p5  ;;  %s1207_s23 = scalar_lea.vmem %s194_s30, 1024 }
  0x2e   : > { %p1208_p2 = scmp.ne.s32.totalorder %s194_s30, %s1207_s23  ;;  %s1343_s6 = smov [#allocation3]  }
  0x2f   : > { %s1212_s24 = sshll.u32 %s1343_s6, 4  ;;  %s1213_s24 = int_to_ptr.vmem [resolvable:$false] %s1212_s24 }
  0x30   : > { %p1210_p6 = pnand %p1208_p2, %p1196_p7  ;;  %s1214_s27 = scalar_lea.vmem %s1213_s24, 2048 }
  0x31   : > { %p1215_p12 = scmp.lt.s32.totalorder %s194_s30, %s1213_s24  ;;  %p1216_p13 = scmp.lt.s32.totalorder %s1214_s27, %s1207_s23 }
  0x32   : > { %p1211_p9 = pneg %p1210_p6 }
  0x33   : > { %p1217_p3 = por %p1216_p13, %p1215_p12 }
  0x35   : > { %p1218_p11 = pnand %p1217_p3, %p1211_p9 }
  0x37   : > { %1221 = shalt.err (!%p1218_p11)
}
  0x38   : > { %s1634_s28 = smov 4   ;;  %s1635_s29 = smov 64  }
  0x39   : > { %1079 = dma.hbm_to_vmem [thread:$0]  (!%p1471_p5), %s192_s25, 1024, %s194_s30, %s180_s26, %s1635_s29, %s1635_s29, %s1634_s28  }
  0x3a   : > { %s203_s9 = sand.u32 1, %s1338_s17   ;;  %s1235_s19 = scalar_lea.vmem %s217_s2, 1024 }
  0x3b   : > { %s204_s10 = scalar_lea.sflag [#allocation7], %s203_s9  ;;  %p1236_p2 = scmp.ne.s32.totalorder %s217_s2, %s1235_s19 }
  0x3c   : > { %s1344_s8 = smov [#allocation6]  }
  0x3d   : > { %p1238_p6 = pnand %p1236_p2, %p1196_p7  ;;  %s1240_s23 = sshll.u32 %s1344_s8, 4  ;;  %s1241_s23 = int_to_ptr.vmem [resolvable:$false] %s1240_s23 }
  0x3e   : > { %s1242_s6 = scalar_lea.vmem %s1241_s23, 2048  ;;  %p1243_p9 = scmp.lt.s32.totalorder %s217_s2, %s1241_s23 }
  0x3f   : > { %p1239_p10 = pneg %p1238_p6  ;;  %p1244_p12 = scmp.lt.s32.totalorder %s1242_s6, %s1235_s19 }
  0x41   : > { %p1245_p13 = por %p1244_p12, %p1243_p9 }
  0x43   : > { %p1246_p3 = pnand %p1245_p13, %p1239_p10 }
  0x45   : > { %1249 = shalt.err (!%p1246_p3)
}
  0x46   : > { %1082 = dma.hbm_to_vmem [thread:$0]  (!%p1471_p5), %s1478_s5, 1024, %s217_s2, %s204_s10, %s1635_s29, %s1635_s29, %s1634_s28  }
  0x47   : > { %228 = sbr.rel (%p1418_p8) target bundleno = 554 (0x22a), region = 32  ;;  %s1503_s26 = sand.u32 (!%p1418_p8), 1, %s1322_s13  }
  0x48   : > { %s930_s25 = sshll.u32 (!%p1418_p8), %s1503_s26, 6  ;;  %s231_s30 = scalar_lea.sflag (!%p1418_p8), [#allocation4], %s1503_s26 }
  0x49   : > { %s1507_s24 = scalar_lea.vmem (!%p1418_p8), [#allocation3], %s930_s25 }
  0x4c   : > { %1301 = dma.done.wait (%p1408_p4), %s231_s30, 1024  }
  0x4d   : > { %1303 = vsyncadd (%p1408_p4), %s231_s30, 4294966272  ;;  %s239_s2 = sand.u32 1, %s1399_s18   ;;  %s1514_s4 = scalar_lea.vmem [#allocation6], %s930_s25 }
  0x4e   : > { %s240_s22 = scalar_lea.sflag [#allocation7], %s239_s2 }
  0x4f   : > { %1305 = dma.done.wait (%p1408_p4), %s240_s22, 1024  }
  0x50   : > { %1307 = vsyncadd (%p1408_p4), %s240_s22, 4294966272 }
  0x51   : > { %1309 = dma.done.wait (%p66_p1), [#allocation7], 1024  }
  0x52   : > { %1311 = vsyncadd (%p66_p1), [#allocation7], 4294966272  ;;  %v1144_v0 = vld [vmem:[%s1514_s4 + $0x38] sm:$0xff]   ;;  %v1145_v1 = vld [vmem:[%s1514_s4 + $0x30] sm:$0xff]   ;;  %s933_s18 = sshll.u32 %s1503_s26, 7  ;;  %s965_s5 = sshll.u32 %s1330_s15, 11 }
  0x53   : > { %998 = vmatprep.subr.bf16.mxu0 %v1144_v0  ;;  %v1146_v2 = vld [vmem:[%s1514_s4 + $0x28] sm:$0xff]   ;;  %v1147_v3 = vld [vmem:[%s1514_s4 + $0x20] sm:$0xff]   ;;  %v1148_v5 = vld [vmem:[%s1514_s4 + $0x18] sm:$0xff]   ;;  %s1541_s20 = scalar_lea.vmem [#allocation9], %s933_s18  ;;  %s1562_s9 = scalar_lea.hbm %s1617_s3, %s965_s5 }
  0x54   : > { %999 = vmatpush3.bf16.msra.mxu0 %v1144_v0  ;;  %v1152_v4 = vld [vmem:[%s1507_s24] sm:$0xff]   ;;  %v1149_v6 = vld [vmem:[%s1514_s4 + $0x10] sm:$0xff]   ;;  %v1160_v7 = vld [vmem:[#allocation8 + $0x38] sm:$0xff]   ;;  %s792_s27 = sshll.u32 %s1541_s20, 4  ;;  %s777_s10 = scalar_lea.sflag [#allocation5], %s1503_s26  ;;  %s1564_s27 = int_to_ptr.vmem [resolvable:$true] %s792_s27 }
  0x55   : > { %1000 = vmatprep.subr.bf16.mxu0 %v1145_v1  ;;  %1014 = vmatprep.mubr.bf16.mxu0 %v1152_v4  ;;  %v1161_v8 = vld [vmem:[#allocation8 + $0x30] sm:$0xff]   ;;  %v1150_v9 = vld [vmem:[%s1514_s4 + $0x8] sm:$0xff]   ;;  %v1151_v11 = vld [vmem:[%s1514_s4] sm:$0xff]   ;;  %s1250_s19 = scalar_lea.vmem %s1564_s27, 2048  ;;  %s1345_s15 = smov [#allocation9]  }
  0x56   : > { %1030 = vmatprep.subr.bf16.mxu1 %v1160_v7  ;;  %v1162_v10 = vld [vmem:[#allocation8 + $0x28] sm:$0xff]   ;;  %v1163_v12 = vld [vmem:[#allocation8 + $0x20] sm:$0xff]   ;;  %v1164_v13 = vld [vmem:[#allocation8 + $0x18] sm:$0xff]   ;;  %p1251_p1 = scmp.ne.s32.totalorder %s1564_s27, %s1250_s19  ;;  %s1254_s8 = sshll.u32 %s1345_s15, 4  ;;  %s1255_s8 = int_to_ptr.vmem [resolvable:$false] %s1254_s8 }
  0x57   : > { %1031 = vmatpush3.bf16.msra.mxu1 %v1160_v7  ;;  %v1153_v14 = vld [vmem:[%s1507_s24 + $0x8] sm:$0xff]   ;;  %v1154_v15 = vld [vmem:[%s1507_s24 + $0x10] sm:$0xff]   ;;  %v1155_v17 = vld [vmem:[%s1507_s24 + $0x18] sm:$0xff]   ;;  %s1256_s23 = scalar_lea.vmem %s1255_s8, 4096  ;;  %p1257_p10 = scmp.lt.s32.totalorder %s1564_s27, %s1255_s8 }
  0x58   : > { %1001 = vmatpush3.bf16.msra.mxu0 %v1145_v1  ;;  %1032 = vmatprep.subr.bf16.mxu1 %v1161_v8  ;;  %v1165_v16 = vld [vmem:[#allocation8 + $0x10] sm:$0xff]   ;;  %v1156_v18 = vld [vmem:[%s1507_s24 + $0x20] sm:$0xff]   ;;  %v1157_v19 = vld [vmem:[%s1507_s24 + $0x28] sm:$0xff]   ;;  %p1252_p4 = pnand %p1251_p1, %p1454_p0  ;;  %p1258_p5 = scmp.lt.s32.totalorder %s1256_s23, %s1250_s19 }
  0x59   : > { %1002 = vmatprep.subr.bf16.mxu0 %v1146_v2  ;;  %v1158_v20 = vld [vmem:[%s1507_s24 + $0x30] sm:$0xff]   ;;  %v1159_v21 = vld [vmem:[%s1507_s24 + $0x38] sm:$0xff]   ;;  %v1166_v22 = vld [vmem:[#allocation8 + $0x8] sm:$0xff]  }
  0x5a   : > { %v1167_v23 = vld [vmem:[#allocation8] sm:$0xff]   ;;  %p1253_p8 = pneg %p1252_p4  ;;  %p1259_p7 = por %p1258_p5, %p1257_p10 }
  0x5b   : > { %1033 = vmatpush3.bf16.msra.mxu1 %v1161_v8 }
  0x5c   : > { %1003 = vmatpush3.bf16.msra.mxu0 %v1146_v2  ;;  %1034 = vmatprep.subr.bf16.mxu1 %v1162_v10  ;;  %p1260_p11 = pnand %p1259_p7, %p1253_p8 }
  0x5d   : > { %1004 = vmatprep.subr.bf16.mxu0 %v1147_v3 }
  0x5f   : > { %1035 = vmatpush3.bf16.msra.mxu1 %v1162_v10 }
  0x60   : > { %1005 = vmatpush3.bf16.msra.mxu0 %v1147_v3  ;;  %1036 = vmatprep.subr.bf16.mxu1 %v1163_v12 }
  0x61   : > { %1006 = vmatprep.subr.bf16.mxu0 %v1148_v5 }
  0x63   : > { %1037 = vmatpush3.bf16.msra.mxu1 %v1163_v12 }
  0x64   : > { %1007 = vmatpush3.bf16.msra.mxu0 %v1148_v5  ;;  %1038 = vmatprep.subr.bf16.mxu1 %v1164_v13 }
  0x65   : > { %1008 = vmatprep.subr.bf16.mxu0 %v1149_v6 }
  0x67   : > { %1039 = vmatpush3.bf16.msra.mxu1 %v1164_v13 }
  0x68   : > { %1009 = vmatpush3.bf16.msra.mxu0 %v1149_v6  ;;  %1040 = vmatprep.subr.bf16.mxu1 %v1165_v16 }
  0x69   : > { %1010 = vmatprep.subr.bf16.mxu0 %v1150_v9 }
  0x6b   : > { %1041 = vmatpush3.bf16.msra.mxu1 %v1165_v16 }
  0x6c   : > { %1011 = vmatpush3.bf16.msra.mxu0 %v1150_v9  ;;  %1042 = vmatprep.subr.bf16.mxu1 %v1166_v22 }
  0x6d   : > { %1012 = vmatprep.subr.bf16.mxu0 %v1151_v11 }
  0x6f   : > { %1043 = vmatpush3.bf16.msra.mxu1 %v1166_v22 }
  0x70   : > { %1013 = vmatpush3.bf16.msra.mxu0 %v1151_v11  ;;  %1044 = vmatprep.subr.bf16.mxu1 %v1167_v23 }
  0x73   : > { %1015 = vmatmul.mubr.bf16.vlgmr.msra.gmra.mxu0 %v1153_v14  ;;  %1045 = vmatpush3.bf16.msra.mxu1 %v1167_v23 }
  0x74   : > { %1018 = vmatprep.mubr.bf16.mxu0 %v1154_v15 }
  0x7b   : > { %1019 = vmatmul.mubr.bf16.gmra.mxu0 %v1155_v17 }
  0x7c   : > { %1022 = vmatprep.mubr.bf16.mxu0 %v1156_v18 }
  0x83   : > { %1023 = vmatmul.mubr.bf16.gmra.mxu0 %v1157_v19 }
  0x84   : > { %1026 = vmatprep.mubr.bf16.mxu0 %v1158_v20 }
  0x8b   : > { %1027 = vmatmul.mubr.bf16.gmra.mxu0 %v1159_v21 }
 0x133   : > { %v1016_v24 = vpop.f32.mrf.mxu0 }
 0x135   : > { %v477_v25 = vpop.f32.mrf.mxu0 }
 0x137   : > { %v1017_v26 = vpop.f32.mrf.mxu0 }
 0x138   : > { %v592_v29 = vpack.c.bf16 %v1017_v26, %v1016_v24 }
 0x139   : > { %v480_v27 = vpop.f32.mrf.mxu0 }
 0x13a   : > { %v591_v28 = vpack.c.bf16 %v480_v27, %v477_v25 }
 0x13b   : > { %v1020_v30 = vpop.f32.mrf.mxu0 }
 0x13c   : > { %1046 = vmatprep.mubr.bf16.mxu1 %v591_v28 }
 0x13d   : > { %v493_v31 = vpop.f32.mrf.mxu0  ;;  %1047 = vmatmul.mubr.bf16.vlgmr.msra.gmra.mxu1 %v592_v29 }
 0x13f   : > { %v1021_v32 = vpop.f32.mrf.mxu0 }
 0x140   : > { %v594_v35 = vpack.c.bf16 %v1021_v32, %v1020_v30 }
 0x141   : > { %v496_v33 = vpop.f32.mrf.mxu0 }
 0x142   : > { %v593_v34 = vpack.c.bf16 %v496_v33, %v493_v31 }
 0x143   : > { %v1024_v36 = vpop.f32.mrf.mxu0 }
 0x144   : > { %1050 = vmatprep.mubr.bf16.mxu1 %v593_v34 }
 0x145   : > { %v509_v37 = vpop.f32.mrf.mxu0  ;;  %1051 = vmatmul.mubr.bf16.gmra.mxu1 %v594_v35 }
 0x147   : > { %v1025_v38 = vpop.f32.mrf.mxu0 }
 0x148   : > { %v596_v41 = vpack.c.bf16 %v1025_v38, %v1024_v36 }
 0x149   : > { %v512_v39 = vpop.f32.mrf.mxu0 }
 0x14a   : > { %v595_v40 = vpack.c.bf16 %v512_v39, %v509_v37 }
 0x14b   : > { %v1028_v42 = vpop.f32.mrf.mxu0 }
 0x14c   : > { %1054 = vmatprep.mubr.bf16.mxu1 %v595_v40 }
 0x14d   : > { %v525_v43 = vpop.f32.mrf.mxu0  ;;  %1055 = vmatmul.mubr.bf16.gmra.mxu1 %v596_v41 }
 0x14f   : > { %v1029_v44 = vpop.f32.mrf.mxu0 }
 0x150   : > { %v598_v47 = vpack.c.bf16 %v1029_v44, %v1028_v42 }
 0x151   : > { %v528_v45 = vpop.f32.mrf.mxu0 }
 0x152   : > { %v597_v46 = vpack.c.bf16 %v528_v45, %v525_v43 }
 0x154   : > { %1058 = vmatprep.mubr.bf16.mxu1 %v597_v46 }
 0x155   : > { %1059 = vmatmul.mubr.bf16.gmra.mxu1 %v598_v47 }
 0x1fd   : > { %v1048_v48 = vpop.f32.mrf.mxu1 }
 0x1fe   : > { %762 = vst [vmem:[%s1541_s20 + $0x10] sm:$0xff] %v1048_v48 }
 0x1ff   : > { %v697_v49 = vpop.f32.mrf.mxu1 }
 0x200   : > { %760 = vst [vmem:[%s1541_s20] sm:$0xff] %v697_v49 }
 0x201   : > { %v1049_v50 = vpop.f32.mrf.mxu1 }
 0x202   : > { %763 = vst [vmem:[%s1541_s20 + $0x18] sm:$0xff] %v1049_v50 }
 0x203   : > { %v700_v51 = vpop.f32.mrf.mxu1 }
 0x204   : > { %761 = vst [vmem:[%s1541_s20 + $0x8] sm:$0xff] %v700_v51 }
 0x205   : > { %v1052_v52 = vpop.f32.mrf.mxu1 }
 0x206   : > { %766 = vst [vmem:[%s1541_s20 + $0x30] sm:$0xff] %v1052_v52 }
 0x207   : > { %v713_v53 = vpop.f32.mrf.mxu1 }
 0x208   : > { %764 = vst [vmem:[%s1541_s20 + $0x20] sm:$0xff] %v713_v53 }
 0x209   : > { %v1053_v54 = vpop.f32.mrf.mxu1 }
 0x20a   : > { %767 = vst [vmem:[%s1541_s20 + $0x38] sm:$0xff] %v1053_v54 }
 0x20b   : > { %v716_v55 = vpop.f32.mrf.mxu1 }
 0x20c   : > { %765 = vst [vmem:[%s1541_s20 + $0x28] sm:$0xff] %v716_v55 }
 0x20d   : > { %v1056_v56 = vpop.f32.mrf.mxu1 }
 0x20e   : > { %770 = vst [vmem:[%s1541_s20 + $0x50] sm:$0xff] %v1056_v56 }
 0x20f   : > { %v729_v57 = vpop.f32.mrf.mxu1 }
 0x210   : > { %768 = vst [vmem:[%s1541_s20 + $0x40] sm:$0xff] %v729_v57 }
 0x211   : > { %v1057_v58 = vpop.f32.mrf.mxu1 }
 0x212   : > { %771 = vst [vmem:[%s1541_s20 + $0x58] sm:$0xff] %v1057_v58 }
 0x213   : > { %v732_v59 = vpop.f32.mrf.mxu1 }
 0x214   : > { %769 = vst [vmem:[%s1541_s20 + $0x48] sm:$0xff] %v732_v59 }
 0x215   : > { %v1060_v60 = vpop.f32.mrf.mxu1 }
 0x216   : > { %774 = vst [vmem:[%s1541_s20 + $0x70] sm:$0xff] %v1060_v60 }
 0x217   : > { %v745_v61 = vpop.f32.mrf.mxu1 }
 0x218   : > { %772 = vst [vmem:[%s1541_s20 + $0x60] sm:$0xff] %v745_v61 }
 0x219   : > { %v1061_v62 = vpop.f32.mrf.mxu1 }
 0x21a   : > { %775 = vst [vmem:[%s1541_s20 + $0x78] sm:$0xff] %v1061_v62 }
 0x21b   : > { %v748_v63 = vpop.f32.mrf.mxu1 }
 0x21c   : > { %773 = vst [vmem:[%s1541_s20 + $0x68] sm:$0xff] %v748_v63 }
 0x21d   : > { %1263 = shalt.err (!%p1260_p11)
}
 0x21e   : > { %s1264_s6 = scalar_lea.hbm %s1562_s9, 2048  ;;  %s1268_s24 = scalar_lea.hbm %s1617_s3, 4096 }
 0x21f   : > { %p1265_p2 = scmp.ne.s32.totalorder %s1562_s9, %s1264_s6  ;;  %p1269_p12 = scmp.lt.s32.totalorder %s1562_s9, %s1617_s3 }
 0x220   : > { %p1270_p13 = scmp.lt.s32.totalorder %s1268_s24, %s1264_s6 }
 0x221   : > { %p1266_p6 = pnand %p1265_p2, %p1454_p0 }
 0x222   : > { %p1271_p3 = por %p1270_p13, %p1269_p12 }
 0x223   : > { %p1267_p9 = pneg %p1266_p6 }
 0x225   : > { %p1272_p1 = pnand %p1271_p3, %p1267_p9 }
 0x227   : > { %1275 = shalt.err (!%p1272_p1)
}
 0x228   : > { %s1346_s4 = smov 128   ;;  %s1347_s18 = smov 8  }
 0x229   : > { %1070 = dma.vmem_to_hbm [thread:$0]  (%p1454_p0), %s1564_s27, 2048, %s1562_s9, %s777_s10, %s1346_s4, %s1346_s4, %s1347_s18  }
 0x22a PF: > { %s807_s20 = sand.u32 1, %s1318_s12   ;;  %p1636_p4 = scmp.ne.s32.totalorder %s1625_s21, 0 }
 0x22b   : > { %p1637_p8 = scmp.ge.s32.totalorder %s1338_s17, 2  ;;  %s808_s5 = scalar_lea.sflag [#allocation5], %s807_s20 }
 0x22d   : > { %p1084_p10 = pnand %p1637_p8, %p1636_p4 }
 0x22f   : > { %p1085_p5 = pneg %p1084_p10 }
 0x231   : > { %1313 = dma.done.wait (%p1085_p5), %s808_s5, 2048  }
 0x232   : > { %1315 = vsyncadd (%p1085_p5), %s808_s5, 4294965248  ;;  %s22_s17 = sadd.s32 1, %s1338_s17   ;;  %s1638_s7 = sld [smem:[#allocation14_spill]] }
 0x233   : > { %p19_p7 = scmp.ge.s32.totalorder %s22_s17, 4   ;;  %s1639_s12 = smov %s1322_s13 }
 0x234   : > { %s1640_s13 = smov %s1326_s14  ;;  %s1641_s14 = smov %s1463_s11 }
 0x235   : > { %s1642_s15 = smov %s1334_s16  ;;  %21 = sbr.rel (!%p19_p7) target bundleno = 10 (0xa), region = 102 }
 0x238   : > { %s1643_s16 = smov %s1638_s7 }
 0x23a   :  { %813 = vsyncpa [#allocation4], 1 }
 0x23b   :  { %815 = vsyncpa [#allocation4 + $0x1], 1 }
 0x23c   :  { %816 = vsyncpa [#allocation7], 1 }
 0x23d   :  { %818 = vsyncpa [#allocation7 + $0x1], 1 }
 0x23e   :  { %819 = vsyncpa [#allocation5], 1 }
 0x23f   :  { %821 = vsyncpa [#allocation5 + $0x1], 1 }

</bundles_post_ra>
